<compile_context>
chip_gen: v7x
topology: tpu7x:2x2x1
jax: 0.10.0
libtpu: 0.0.40
codegen_flags: <defaults>
</compile_context>

<pallas_src>
import functools

import jax
import jax.numpy as jnp
from jax.experimental import pallas as pl
from jax.experimental.pallas import tpu as pltpu

_LANE = 128        # vreg lane width (last dim)
_SUBLANE = 8       # vreg sublane width (second-to-last dim)
_QUARTER = _LANE // 4   # 32: quarter of a lane block (lane-packed gate slot)


def _round_up(x, m):
    return (x + m - 1) // m * m


def _use_lane_packed(hidden_size):
    # i, g, o (+ duplicated g) fit in one 128-lane block only while H <= 32.
    return hidden_size <= _QUARTER


# ---------------------------------------------------------------------------
# Fused kernel body: n_layers LSTM cells (seq=1, zero init state) + Linear
# ---------------------------------------------------------------------------
def _make_fused_kernel(n_layers, hidden_size, h_pad, lane_packed, return_state):
    """Ref layout (per batch-row tile, all VMEM, already padded):
      refs[0]            x        (bt, in_pad)                 f32
      refs[1:1+L]        w_ih^T   (prev_pad, gcols)            bf16, per layer
      refs[1+L:1+2L]     b_ih+b_hh(1, gcols)                   f32,  per layer
      refs[1+2L]         w_fo^T   (h_pad, out_pad)             bf16
      refs[2+2L]         b_fo     (1, out_pad)                 f32
      refs[3+2L]         out      (bt, out_pad)                f32
      refs[4+2L]         h_n      (L, bt, h_pad)  (if return_state)
      refs[5+2L]         c_n      (L, bt, h_pad)  (if return_state)
    """

    def kernel(*refs):
        x_ref = refs[0]
        w_refs = refs[1:1 + n_layers]
        b_refs = refs[1 + n_layers:1 + 2 * n_layers]
        w_fo_ref = refs[1 + 2 * n_layers]
        b_fo_ref = refs[2 + 2 * n_layers]
        out_ref = refs[3 + 2 * n_layers]
        if return_state:
            h_n_ref = refs[4 + 2 * n_layers]
            c_n_ref = refs[5 + 2 * n_layers]

        layer_in = x_ref[...]                               # f32
        for layer in range(n_layers):                       # static unroll
            gates = (
                jnp.dot(layer_in.astype(jnp.bfloat16), w_refs[layer][...],
                        preferred_element_type=jnp.float32)
                + b_refs[layer][...]
            )
            if lane_packed:
                # One 128-lane block, quarters [i | g | o | g-dup], each gate
                # occupying lanes [q*32 : q*32 + H].  sigmoid/tanh once per
                # vreg; alignment via XLU rotations.  The duplicated g quarter
                # makes the quarter-rotation valid under either rotate
                # direction; the o alignment is a half-rotation (symmetric).
                sig = jax.nn.sigmoid(gates)
                th = jnp.tanh(gates)
                g_al = pltpu.roll(th, shift=_QUARTER, axis=1)
                o_al = pltpu.roll(sig, shift=2 * _QUARTER, axis=1)
                c_new = sig * g_al                  # lanes [0:H] = i * g
                h_new = o_al * jnp.tanh(c_new)      # lanes [0:H] = o * tanh(c)
                # Lanes [H:128] carry bounded junk; they hit zero weight rows
                # downstream and are sliced off in the wrapper.
            else:
                # (i, g, o) in three h_pad-wide, vreg-aligned column blocks.
                i_g = jax.nn.sigmoid(gates[:, 0 * h_pad:1 * h_pad])
                g_g = jnp.tanh(gates[:, 1 * h_pad:2 * h_pad])
                o_g = jax.nn.sigmoid(gates[:, 2 * h_pad:3 * h_pad])
                c_new = i_g * g_g
                h_new = o_g * jnp.tanh(c_new)

            if return_state:
                h_n_ref[layer, :, :] = h_new
                c_n_ref[layer, :, :] = c_new
            layer_in = h_new

        out_ref[...] = (
            jnp.dot(layer_in.astype(jnp.bfloat16), w_fo_ref[...],
                    preferred_element_type=jnp.float32)
            + b_fo_ref[...]
        )

    return kernel


# ---------------------------------------------------------------------------
# Parameter init (PyTorch-shaped) + one-time packing
# ---------------------------------------------------------------------------
def init_lstm_net_params(key, input_size, output_size, hidden_size, n_layers):
    """Deterministic param init mirroring nn.LSTM / nn.Linear shapes."""
    params = {"lstm": [], "fo": {}}
    k = 1.0 / jnp.sqrt(jnp.float32(hidden_size))
    for layer in range(n_layers):
        in_dim = input_size if layer == 0 else hidden_size
        key, k1, k2, k3, k4 = jax.random.split(key, 5)
        params["lstm"].append({
            "w_ih": jax.random.uniform(k1, (4 * hidden_size, in_dim),
                                       jnp.float32, -k, k),
            "w_hh": jax.random.uniform(k2, (4 * hidden_size, hidden_size),
                                       jnp.float32, -k, k),
            "b_ih": jax.random.uniform(k3, (4 * hidden_size,),
                                       jnp.float32, -k, k),
            "b_hh": jax.random.uniform(k4, (4 * hidden_size,),
                                       jnp.float32, -k, k),
        })
    key, k1, k2 = jax.random.split(key, 3)
    params["fo"]["w"] = jax.random.uniform(k1, (output_size, hidden_size),
                                           jnp.float32, -k, k)
    params["fo"]["b"] = jax.random.uniform(k2, (output_size,),
                                           jnp.float32, -k, k)
    return params


def pack_params(params, input_size, output_size, hidden_size, n_layers):
    """One-time preprocessing hoisted out of the forward pass:
    drop W_hh and the f-gate, transpose, sum biases, zero-pad to lane-dense
    shapes, cast weights to bf16.  Gate order in PyTorch is (i, f, g, o)."""
    H = hidden_size
    h_pad = _round_up(H, _LANE)
    in_pad = _round_up(input_size, _LANE)
    out_pad = _round_up(output_size, _LANE)
    lane_packed = _use_lane_packed(H)
    gcols = _LANE if lane_packed else 3 * h_pad

    packed = {"w": [], "b": []}
    for layer in range(n_layers):
        p = params["lstm"][layer]
        in_dim = input_size if layer == 0 else H
        in_dim_pad = in_pad if layer == 0 else h_pad

        w_t = p["w_ih"].T                                    # (in, 4H) [i|f|g|o]
        b = p["b_ih"] + p["b_hh"]                            # (4H,)
        w_i, w_g, w_o = w_t[:, :H], w_t[:, 2 * H:3 * H], w_t[:, 3 * H:4 * H]
        b_i, b_g, b_o = b[:H], b[2 * H:3 * H], b[3 * H:4 * H]

        if lane_packed:
            w_pack = jnp.zeros((in_dim_pad, _LANE), jnp.float32)
            b_pack = jnp.zeros((1, _LANE), jnp.float32)
            # quarters: [i | g | o | g-dup]  (dup g fills the dead 4th slot)
            for q, (wq, bq) in enumerate(
                    [(w_i, b_i), (w_g, b_g), (w_o, b_o), (w_g, b_g)]):
                w_pack = w_pack.at[:in_dim,
                                   q * _QUARTER:q * _QUARTER + H].set(wq)
                b_pack = b_pack.at[:, q * _QUARTER:q * _QUARTER + H].set(bq)
        else:
            w_sel = jnp.stack([w_i, w_g, w_o], axis=1)       # (in, 3, H)
            b_sel = jnp.stack([b_i, b_g, b_o], axis=0)       # (3, H)
            w_pack = jnp.zeros((in_dim_pad, 3, h_pad), jnp.float32)
            w_pack = w_pack.at[:in_dim, :, :H].set(w_sel).reshape(
                in_dim_pad, gcols)
            b_pack = jnp.zeros((3, h_pad), jnp.float32)
            b_pack = b_pack.at[:, :H].set(b_sel).reshape(1, gcols)

        packed["w"].append(w_pack.astype(jnp.bfloat16))      # bf16 weights
        packed["b"].append(b_pack)                           # bias stays f32

    w_fo_pad = jnp.zeros((h_pad, out_pad), jnp.float32)
    w_fo_pad = w_fo_pad.at[:H, :output_size].set(params["fo"]["w"].T)
    b_fo_pad = jnp.zeros((1, out_pad), jnp.float32)
    b_fo_pad = b_fo_pad.at[:, :output_size].set(params["fo"]["b"])
    packed["w_fo"] = w_fo_pad.astype(jnp.bfloat16)
    packed["b_fo"] = b_fo_pad
    return packed


# ---------------------------------------------------------------------------
# lstmNet forward (matches the PyTorch module semantics)
# ---------------------------------------------------------------------------
def lstm_net_forward(packed, x, *, input_size, output_size, hidden_size,
                     n_layers, return_state=True):
    """Returns (output, (h_n, c_n)) exactly like lstmNet.forward
    (or just `output` if return_state=False).

    x: (input_size,) or (batch, input_size)
    output: (batch, output_size);  h_n, c_n: (n_layers, batch, hidden_size)

    Only valid under the module's hard-coded seq_len == 1 and zero
    init_hidden() (W_hh / f-gate are eliminated under that assumption).
    """
    if x.ndim == 1:
        x = x.reshape(1, input_size)
    batch = x.shape[0]

    H = hidden_size
    h_pad = _round_up(H, _LANE)
    in_pad = _round_up(input_size, _LANE)
    out_pad = _round_up(output_size, _LANE)
    lane_packed = _use_lane_packed(H)
    gcols = _LANE if lane_packed else 3 * h_pad

    # Batch-row tiles on a "parallel" grid axis (v7x: shards across 2 TCs
    # once there is more than one tile; no-op on v5e/v6e).
    bt = min(_round_up(batch, _SUBLANE), 128)
    b_pad = _round_up(batch, bt)
    grid_b = b_pad // bt

    # Single pad op; zero padding is exact (junk rows are sliced off below).
    x_p = jnp.pad(x.astype(jnp.float32),
                  ((0, b_pad - batch), (0, in_pad - input_size)))

    kernel = _make_fused_kernel(n_layers, H, h_pad, lane_packed, return_state)

    in_dims_pad = [in_pad] + [h_pad] * (n_layers - 1)
    in_specs = (
        [pl.BlockSpec((bt, in_pad), lambda i: (i, 0))]
        + [pl.BlockSpec((d, gcols), lambda i: (0, 0)) for d in in_dims_pad]
        + [pl.BlockSpec((1, gcols), lambda i: (0, 0))] * n_layers
        + [pl.BlockSpec((h_pad, out_pad), lambda i: (0, 0)),
           pl.BlockSpec((1, out_pad), lambda i: (0, 0))]
    )
    out_shape = [jax.ShapeDtypeStruct((b_pad, out_pad), jnp.float32)]
    out_specs = [pl.BlockSpec((bt, out_pad), lambda i: (i, 0))]
    if return_state:
        out_shape += [jax.ShapeDtypeStruct((n_layers, b_pad, h_pad),
                                           jnp.float32)] * 2
        out_specs += [pl.BlockSpec((n_layers, bt, h_pad),
                                   lambda i: (0, i, 0))] * 2

    # Advisory cost estimate so XLA can overlap the call with neighbour ops.
    flops = 2 * b_pad * (sum(d * gcols for d in in_dims_pad) + h_pad * out_pad)
    trans = b_pad * n_layers * (3 * _LANE if lane_packed else 4 * h_pad)
    out_bytes = b_pad * out_pad * 4
    if return_state:
        out_bytes += 2 * n_layers * b_pad * h_pad * 4
    bytes_accessed = (
        b_pad * in_pad * 4
        + sum(int(w.size) * 2 for w in packed["w"])
        + sum(int(b.size) * 4 for b in packed["b"])
        + int(packed["w_fo"].size) * 2 + int(packed["b_fo"].size) * 4
        + out_bytes
    )

    results = pl.pallas_call(
        kernel,
        grid=(grid_b,),
        out_shape=tuple(out_shape),
        in_specs=in_specs,
        out_specs=tuple(out_specs),
        compiler_params=pltpu.CompilerParams(
            dimension_semantics=("parallel",)),
        cost_estimate=pl.CostEstimate(
            flops=int(flops), transcendentals=int(trans),
            bytes_accessed=int(bytes_accessed)),
    )(x_p, *packed["w"], *packed["b"], packed["w_fo"], packed["b_fo"])

    if return_state:
        out_p, h_n_p, c_n_p = results
    else:
        (out_p,) = results

    output = out_p[:batch, :output_size]
    if not return_state:
        return output
    h_n = h_n_p[:, :batch, :hidden_size]
    c_n = c_n_p[:, :batch, :hidden_size]
    return output, (h_n, c_n)


# ---------------------------------------------------------------------------
# Pure-JAX f32 reference (unpadded) for the correctness check
# ---------------------------------------------------------------------------
def _reference_forward(params, x, hidden_size, n_layers):
    if x.ndim == 1:
        x = x.reshape(1, x.shape[0])
    layer_in = x
    H = hidden_size
    h_list, c_list = [], []
    for layer in range(n_layers):
        p = params["lstm"][layer]
        gates = layer_in @ p["w_ih"].T + (p["b_ih"] + p["b_hh"])
        i = jax.nn.sigmoid(gates[:, 0 * H:1 * H])
        g = jnp.tanh(gates[:, 2 * H:3 * H])
        o = jax.nn.sigmoid(gates[:, 3 * H:4 * H])
        c = i * g                      # f * c0 == 0 (zero init state)
        h = o * jnp.tanh(c)
        h_list.append(h)
        c_list.append(c)
        layer_in = h
    out = layer_in @ params["fo"]["w"].T + params["fo"]["b"]
    return out, (jnp.stack(h_list), jnp.stack(c_list))


# ---------------------------------------------------------------------------
# main
# ---------------------------------------------------------------------------
if __name__ == "__main__":
    def _check(key, input_size, output_size, hidden_size, n_layers, batch):
        key, pkey, xkey = jax.random.split(key, 3)
        params = init_lstm_net_params(pkey, input_size, output_size,
                                      hidden_size, n_layers)
        packed = pack_params(params, input_size, output_size,
                             hidden_size, n_layers)
        x = jax.random.normal(xkey, (batch, input_size), jnp.float32)

        fwd = jax.jit(functools.partial(lstm_net_forward,
                                        input_size=input_size,
                                        output_size=output_size,
                                        hidden_size=hidden_size,
                                        n_layers=n_layers))
        output, (h_n, c_n) = fwd(packed, x)
        jax.block_until_ready((output, h_n, c_n))

        assert output.shape == (batch, output_size)
        assert h_n.shape == (n_layers, batch, hidden_size)
        assert c_n.shape == (n_layers, batch, hidden_size)

        ref_out, (ref_h, ref_c) = _reference_forward(params, x, hidden_size,
                                                     n_layers)
        # bf16 weights in the kernel -> relaxed tolerance vs the f32 reference.
        assert jnp.allclose(output, ref_out, atol=1e-2, rtol=1e-2)
        assert jnp.allclose(h_n, ref_h, atol=1e-2, rtol=1e-2)
        assert jnp.allclose(c_n, ref_c, atol=1e-2, rtol=1e-2)

    root = jax.random.PRNGKey(0)
    k1, k2 = jax.random.split(root)
    # Lane-packed single-block gate path (hidden_size <= 32).
    _check(k1, input_size=16, output_size=8, hidden_size=32, n_layers=2,
           batch=2)
    # Split (i,g,o) three-block fallback path (hidden_size > 32).
    _check(k2, input_size=16, output_size=8, hidden_size=48, n_layers=2,
           batch=2)

    print("KERNEL_OK")
</pallas_src>

<mosaic_0001>
module attributes {stable_mosaic.version = 11 : i64} {
  func.func @kernel(%arg0: i32, %arg1: memref<8x128xf32, #tpu.memory_space<vmem>>, %arg2: memref<128x128xbf16, #tpu.memory_space<vmem>>, %arg3: memref<128x128xbf16, #tpu.memory_space<vmem>>, %arg4: memref<1x128xf32, #tpu.memory_space<vmem>>, %arg5: memref<1x128xf32, #tpu.memory_space<vmem>>, %arg6: memref<128x128xbf16, #tpu.memory_space<vmem>>, %arg7: memref<1x128xf32, #tpu.memory_space<vmem>>, %arg8: memref<8x128xf32, #tpu.memory_space<vmem>>, %arg9: memref<2x8x128xf32, #tpu.memory_space<vmem>>, %arg10: memref<2x8x128xf32, #tpu.memory_space<vmem>>) attributes {dimension_semantics = [#tpu.dimension_semantics<parallel>], iteration_bounds = array<i64: 1>, scalar_prefetch = 0 : i64, scratch_operands = 0 : i64, tpu.core_type = #tpu.core_type<tc>, window_params = [{transform_indices = @transform_0, window_bounds = array<i64: 8, 128>}, {pipeline_mode = #tpu.pipeline_mode<synchronous>, transform_indices = @transform_1, window_bounds = array<i64: 128, 128>}, {pipeline_mode = #tpu.pipeline_mode<synchronous>, transform_indices = @transform_2, window_bounds = array<i64: 128, 128>}, {pipeline_mode = #tpu.pipeline_mode<synchronous>, transform_indices = @transform_3, window_bounds = array<i64: 1, 128>}, {pipeline_mode = #tpu.pipeline_mode<synchronous>, transform_indices = @transform_4, window_bounds = array<i64: 1, 128>}, {pipeline_mode = #tpu.pipeline_mode<synchronous>, transform_indices = @transform_5, window_bounds = array<i64: 128, 128>}, {pipeline_mode = #tpu.pipeline_mode<synchronous>, transform_indices = @transform_6, window_bounds = array<i64: 1, 128>}, {transform_indices = @transform_7, window_bounds = array<i64: 8, 128>}, {transform_indices = @transform_8, window_bounds = array<i64: 2, 8, 128>}, {transform_indices = @transform_9, window_bounds = array<i64: 2, 8, 128>}]} {
    %c0 = arith.constant 0 : index
    %c0_0 = arith.constant 0 : index
    %0 = vector.load %arg1[%c0, %c0_0] : memref<8x128xf32, #tpu.memory_space<vmem>>, vector<8x128xf32>
    %1 = arith.truncf %0 : vector<8x128xf32> to vector<8x128xbf16>
    %c0_1 = arith.constant 0 : index
    %c0_2 = arith.constant 0 : index
    %2 = vector.load %arg2[%c0_1, %c0_2] : memref<128x128xbf16, #tpu.memory_space<vmem>>, vector<128x128xbf16>
    %cst = arith.constant dense<0.000000e+00> : vector<8x128xf32>
    %3 = tpu.matmul %1, %2, %cst {dimension_numbers = #tpu.dot_dimension_numbers<[1], [0], [0], [1], [0, 0, 1, 1], [], []>} : vector<8x128xbf16>, vector<128x128xbf16>, vector<8x128xf32> -> vector<8x128xf32>
    %c0_3 = arith.constant 0 : index
    %c0_4 = arith.constant 0 : index
    %4 = vector.load %arg4[%c0_3, %c0_4] : memref<1x128xf32, #tpu.memory_space<vmem>>, vector<1x128xf32>
    %5 = vector.broadcast %4 : vector<1x128xf32> to vector<8x128xf32>
    %6 = arith.addf %3, %5 : vector<8x128xf32>
    %7 = arith.negf %6 : vector<8x128xf32>
    %8 = math.exp %7 : vector<8x128xf32>
    %cst_5 = arith.constant 1.000000e+00 : f32
    %9 = vector.broadcast %cst_5 : f32 to vector<8x128xf32>
    %10 = arith.addf %9, %8 : vector<8x128xf32>
    %11 = arith.divf %9, %10 : vector<8x128xf32>
    %12 = math.tanh %6 : vector<8x128xf32>
    %c32_i32 = arith.constant 32 : i32
    %13 = tpu.dynamic_rotate %12 by %c32_i32 dim 1 : vector<8x128xf32>, i32 -> vector<8x128xf32>
    %c64_i32 = arith.constant 64 : i32
    %14 = tpu.dynamic_rotate %11 by %c64_i32 dim 1 : vector<8x128xf32>, i32 -> vector<8x128xf32>
    %15 = arith.mulf %11, %13 : vector<8x128xf32>
    %16 = math.tanh %15 : vector<8x128xf32>
    %17 = arith.mulf %14, %16 : vector<8x128xf32>
    %c0_6 = arith.constant 0 : index
    %c0_7 = arith.constant 0 : index
    %c0_8 = arith.constant 0 : index
    %18 = vector.load %arg9[%c0_6, %c0_7, %c0_8] : memref<2x8x128xf32, #tpu.memory_space<vmem>>, vector<1x8x128xf32>
    %19 = vector.shape_cast %18 : vector<1x8x128xf32> to vector<8x128xf32>
    %20 = vector.shape_cast %17 : vector<8x128xf32> to vector<1x8x128xf32>
    tpu.vector_store %arg9[%c0_6, %c0_7, %c0_8], %20 {strides = array<i32>} : memref<2x8x128xf32, #tpu.memory_space<vmem>>, vector<1x8x128xf32>,
    %c0_9 = arith.constant 0 : index
    %c0_10 = arith.constant 0 : index
    %c0_11 = arith.constant 0 : index
    %21 = vector.load %arg10[%c0_9, %c0_10, %c0_11] : memref<2x8x128xf32, #tpu.memory_space<vmem>>, vector<1x8x128xf32>
    %22 = vector.shape_cast %21 : vector<1x8x128xf32> to vector<8x128xf32>
    %23 = vector.shape_cast %15 : vector<8x128xf32> to vector<1x8x128xf32>
    tpu.vector_store %arg10[%c0_9, %c0_10, %c0_11], %23 {strides = array<i32>} : memref<2x8x128xf32, #tpu.memory_space<vmem>>, vector<1x8x128xf32>,
    %24 = arith.truncf %17 : vector<8x128xf32> to vector<8x128xbf16>
    %c0_12 = arith.constant 0 : index
    %c0_13 = arith.constant 0 : index
    %25 = vector.load %arg3[%c0_12, %c0_13] : memref<128x128xbf16, #tpu.memory_space<vmem>>, vector<128x128xbf16>
    %cst_14 = arith.constant dense<0.000000e+00> : vector<8x128xf32>
    %26 = tpu.matmul %24, %25, %cst_14 {dimension_numbers = #tpu.dot_dimension_numbers<[1], [0], [0], [1], [0, 0, 1, 1], [], []>} : vector<8x128xbf16>, vector<128x128xbf16>, vector<8x128xf32> -> vector<8x128xf32>
    %c0_15 = arith.constant 0 : index
    %c0_16 = arith.constant 0 : index
    %27 = vector.load %arg5[%c0_15, %c0_16] : memref<1x128xf32, #tpu.memory_space<vmem>>, vector<1x128xf32>
    %28 = vector.broadcast %27 : vector<1x128xf32> to vector<8x128xf32>
    %29 = arith.addf %26, %28 : vector<8x128xf32>
    %30 = arith.negf %29 : vector<8x128xf32>
    %31 = math.exp %30 : vector<8x128xf32>
    %cst_17 = arith.constant 1.000000e+00 : f32
    %32 = vector.broadcast %cst_17 : f32 to vector<8x128xf32>
    %33 = arith.addf %32, %31 : vector<8x128xf32>
    %34 = arith.divf %32, %33 : vector<8x128xf32>
    %35 = math.tanh %29 : vector<8x128xf32>
    %c32_i32_18 = arith.constant 32 : i32
    %36 = tpu.dynamic_rotate %35 by %c32_i32_18 dim 1 : vector<8x128xf32>, i32 -> vector<8x128xf32>
    %c64_i32_19 = arith.constant 64 : i32
    %37 = tpu.dynamic_rotate %34 by %c64_i32_19 dim 1 : vector<8x128xf32>, i32 -> vector<8x128xf32>
    %38 = arith.mulf %34, %36 : vector<8x128xf32>
    %39 = math.tanh %38 : vector<8x128xf32>
    %40 = arith.mulf %37, %39 : vector<8x128xf32>
    %c1 = arith.constant 1 : index
    %c0_20 = arith.constant 0 : index
    %c0_21 = arith.constant 0 : index
    %41 = vector.load %arg9[%c1, %c0_20, %c0_21] : memref<2x8x128xf32, #tpu.memory_space<vmem>>, vector<1x8x128xf32>
    %42 = vector.shape_cast %41 : vector<1x8x128xf32> to vector<8x128xf32>
    %43 = vector.shape_cast %40 : vector<8x128xf32> to vector<1x8x128xf32>
    tpu.vector_store %arg9[%c1, %c0_20, %c0_21], %43 {strides = array<i32>} : memref<2x8x128xf32, #tpu.memory_space<vmem>>, vector<1x8x128xf32>,
    %c1_22 = arith.constant 1 : index
    %c0_23 = arith.constant 0 : index
    %c0_24 = arith.constant 0 : index
    %44 = vector.load %arg10[%c1_22, %c0_23, %c0_24] : memref<2x8x128xf32, #tpu.memory_space<vmem>>, vector<1x8x128xf32>
    %45 = vector.shape_cast %44 : vector<1x8x128xf32> to vector<8x128xf32>
    %46 = vector.shape_cast %38 : vector<8x128xf32> to vector<1x8x128xf32>
    tpu.vector_store %arg10[%c1_22, %c0_23, %c0_24], %46 {strides = array<i32>} : memref<2x8x128xf32, #tpu.memory_space<vmem>>, vector<1x8x128xf32>,
    %47 = arith.truncf %40 : vector<8x128xf32> to vector<8x128xbf16>
    %c0_25 = arith.constant 0 : index
    %c0_26 = arith.constant 0 : index
    %48 = vector.load %arg6[%c0_25, %c0_26] : memref<128x128xbf16, #tpu.memory_space<vmem>>, vector<128x128xbf16>
    %cst_27 = arith.constant dense<0.000000e+00> : vector<8x128xf32>
    %49 = tpu.matmul %47, %48, %cst_27 {dimension_numbers = #tpu.dot_dimension_numbers<[1], [0], [0], [1], [0, 0, 1, 1], [], []>} : vector<8x128xbf16>, vector<128x128xbf16>, vector<8x128xf32> -> vector<8x128xf32>
    %c0_28 = arith.constant 0 : index
    %c0_29 = arith.constant 0 : index
    %50 = vector.load %arg7[%c0_28, %c0_29] : memref<1x128xf32, #tpu.memory_space<vmem>>, vector<1x128xf32>
    %51 = vector.broadcast %50 : vector<1x128xf32> to vector<8x128xf32>
    %52 = arith.addf %49, %51 : vector<8x128xf32>
    %c0_30 = arith.constant 0 : index
    %c0_31 = arith.constant 0 : index
    %53 = vector.load %arg8[%c0_30, %c0_31] : memref<8x128xf32, #tpu.memory_space<vmem>>, vector<8x128xf32>
    tpu.vector_store %arg8[%c0_30, %c0_31], %52 {strides = array<i32>} : memref<8x128xf32, #tpu.memory_space<vmem>>, vector<8x128xf32>,
    return
  }
  func.func @transform_0(%arg0: i32) -> (i32, i32) {
    %c0_i32 = arith.constant 0 : i32
    %c0_i32_0 = arith.constant 0 : i32
    return %arg0, %c0_i32 : i32, i32
  }
  func.func @transform_1(%arg0: i32) -> (i32, i32) {
    %c0_i32 = arith.constant 0 : i32
    %c0_i32_0 = arith.constant 0 : i32
    %c0_i32_1 = arith.constant 0 : i32
    return %c0_i32, %c0_i32_0 : i32, i32
  }
  func.func @transform_2(%arg0: i32) -> (i32, i32) {
    %c0_i32 = arith.constant 0 : i32
    %c0_i32_0 = arith.constant 0 : i32
    %c0_i32_1 = arith.constant 0 : i32
    return %c0_i32, %c0_i32_0 : i32, i32
  }
  func.func @transform_3(%arg0: i32) -> (i32, i32) {
    %c0_i32 = arith.constant 0 : i32
    %c0_i32_0 = arith.constant 0 : i32
    %c0_i32_1 = arith.constant 0 : i32
    return %c0_i32, %c0_i32_0 : i32, i32
  }
  func.func @transform_4(%arg0: i32) -> (i32, i32) {
    %c0_i32 = arith.constant 0 : i32
    %c0_i32_0 = arith.constant 0 : i32
    %c0_i32_1 = arith.constant 0 : i32
    return %c0_i32, %c0_i32_0 : i32, i32
  }
  func.func @transform_5(%arg0: i32) -> (i32, i32) {
    %c0_i32 = arith.constant 0 : i32
    %c0_i32_0 = arith.constant 0 : i32
    %c0_i32_1 = arith.constant 0 : i32
    return %c0_i32, %c0_i32_0 : i32, i32
  }
  func.func @transform_6(%arg0: i32) -> (i32, i32) {
    %c0_i32 = arith.constant 0 : i32
    %c0_i32_0 = arith.constant 0 : i32
    %c0_i32_1 = arith.constant 0 : i32
    return %c0_i32, %c0_i32_0 : i32, i32
  }
  func.func @transform_7(%arg0: i32) -> (i32, i32) {
    %c0_i32 = arith.constant 0 : i32
    %c0_i32_0 = arith.constant 0 : i32
    return %arg0, %c0_i32 : i32, i32
  }
  func.func @transform_8(%arg0: i32) -> (i32, i32, i32) {
    %c0_i32 = arith.constant 0 : i32
    %c0_i32_0 = arith.constant 0 : i32
    %c0_i32_1 = arith.constant 0 : i32
    return %c0_i32, %arg0, %c0_i32_0 : i32, i32, i32
  }
  func.func @transform_9(%arg0: i32) -> (i32, i32, i32) {
    %c0_i32 = arith.constant 0 : i32
    %c0_i32_0 = arith.constant 0 : i32
    %c0_i32_1 = arith.constant 0 : i32
    return %c0_i32, %arg0, %c0_i32_0 : i32, i32, i32
  }
}

</mosaic_0001>

<bundles_post_ra>
// kernel: lstm_net_forward.1
= control target key start
LH: loop header
LB: loop body
LE: loop exit
PB: predicated region body
PF: predicated region fallthrough
CT: control target
= control target key end

     0   :  { %15 = vsyncpa [#allocation3], 0  ;;  %s864_s0 = inlined_call_operand.vmem [shape: f32[8,128], index: 0, kind: input, shape index: {}]   ;;  %s865_s1 = inlined_call_operand.hbm [shape: bf16[128,128], index: 1, kind: input, shape index: {}]   ;;  %s866_s2 = inlined_call_operand.hbm [shape: bf16[128,128], index: 2, kind: input, shape index: {}]   ;;  %s867_s3 = inlined_call_operand.vmem [shape: f32[1,128], index: 3, kind: input, shape index: {}]   ;;  %s868_s4 = inlined_call_operand.vmem [shape: f32[1,128], index: 4, kind: input, shape index: {}]   ;;  %s869_s5 = inlined_call_operand.hbm [shape: bf16[128,128], index: 5, kind: input, shape index: {}]   ;;  %s870_s6 = inlined_call_operand.vmem [shape: f32[1,128], index: 6, kind: input, shape index: {}]   ;;  %s871_s7 = inlined_call_operand.vmem [shape: f32[8,128], index: 7, kind: output, shape index: {0}]   ;;  %s872_s8 = inlined_call_operand.vmem [shape: f32[2,8,128], index: 8, kind: output, shape index: {1}]   ;;  %s873_s9 = inlined_call_operand.vmem [shape: f32[2,8,128], index: 9, kind: output, shape index: {2}]  }
   0x1   :  { %16 = vsyncpa [#allocation5], 0  ;;  %s693_s30 = smov [#allocation4]   ;;  %s694_s11 = smov [#allocation2]  }
   0x2   :  { %s36_s10 = sshll.u32 %s693_s30, 4  ;;  %s24_s12 = sshll.u32 %s694_s11, 4  ;;  %s37_s10 = int_to_ptr.vmem [resolvable:$true] %s36_s10  ;;  %s751_s12 = int_to_ptr.vmem [resolvable:$true] %s24_s12 }
   0x3   :  { %s623_s15 = scalar_lea.hbm %s866_s2, 1024 }
   0x4   :  { %p624_p0 = scmp.ne.s32.totalorder %s866_s2, %s623_s15  ;;  %p627_p1 = scmp.lt.u32.totalorder %s623_s15, %s866_s2 }
   0x6   :  { %p629_p2 = pnand %p627_p1, %p624_p0 }
   0x8   :  { %632 = shalt.err (!%p629_p2)
}
   0x9   :  { %s633_s20 = scalar_lea.vmem %s37_s10, 1024  ;;  %p638_p4 = scmp.lt.s32.totalorder %s37_s10, %s37_s10 }
   0xa   :  { %p634_p3 = scmp.ne.s32.totalorder %s37_s10, %s633_s20  ;;  %p639_p5 = scmp.lt.s32.totalorder %s633_s20, %s633_s20 }
   0xc   :  { %p640_p6 = por %p639_p5, %p638_p4 }
   0xe   :  { %p641_p7 = pnand %p640_p6, %p634_p3 }
  0x10   :  { %644 = shalt.err (!%p641_p7)
}
  0x11   :  { %s695_s21 = smov 64   ;;  %s696_s22 = smov 4  }
  0x12   :  { %42 = dma.hbm_to_vmem [thread:$0]  %s866_s2, 1024, %s37_s10, [#allocation5], %s695_s21, %s695_s21, %s696_s22  }
  0x13   :  { %s645_s27 = scalar_lea.hbm %s865_s1, 1024 }
  0x14   :  { %p646_p8 = scmp.ne.s32.totalorder %s865_s1, %s645_s27  ;;  %p649_p9 = scmp.lt.u32.totalorder %s645_s27, %s865_s1 }
  0x16   :  { %p651_p10 = pnand %p649_p9, %p646_p8 }
  0x18   :  { %654 = shalt.err (!%p651_p10)
}
  0x19   :  { %s655_s13 = scalar_lea.vmem %s751_s12, 1024  ;;  %p660_p12 = scmp.lt.s32.totalorder %s751_s12, %s751_s12 }
  0x1a   :  { %p656_p11 = scmp.ne.s32.totalorder %s751_s12, %s655_s13  ;;  %p661_p13 = scmp.lt.s32.totalorder %s655_s13, %s655_s13 }
  0x1c   :  { %p662_p0 = por %p661_p13, %p660_p12 }
  0x1e   :  { %p663_p1 = pnand %p662_p0, %p656_p11 }
  0x20   :  { %666 = shalt.err (!%p663_p1)
}
  0x21   :  { %30 = dma.hbm_to_vmem [thread:$0]  %s865_s1, 1024, %s751_s12, [#allocation3], %s695_s21, %s695_s21, %s696_s22  }
  0x22   :  { %s697_s14 = smov [#allocation6]   ;;  %s667_s18 = scalar_lea.hbm %s869_s5, 1024 }
  0x23   :  { %s52_s15 = sshll.u32 %s697_s14, 4  ;;  %p668_p2 = scmp.ne.s32.totalorder %s869_s5, %s667_s18  ;;  %s53_s15 = int_to_ptr.vmem [resolvable:$true] %s52_s15 }
  0x24   :  { %p671_p3 = scmp.lt.u32.totalorder %s667_s18, %s869_s5 }
  0x26   :  { %p673_p4 = pnand %p671_p3, %p668_p2 }
  0x28   :  { %676 = shalt.err (!%p673_p4)
}
  0x29   :  { %s677_s25 = scalar_lea.vmem %s53_s15, 1024  ;;  %p682_p6 = scmp.lt.s32.totalorder %s53_s15, %s53_s15 }
  0x2a   :  { %p678_p5 = scmp.ne.s32.totalorder %s53_s15, %s677_s25  ;;  %p683_p7 = scmp.lt.s32.totalorder %s677_s25, %s677_s25 }
  0x2c   :  { %p684_p8 = por %p683_p7, %p682_p6 }
  0x2e   :  { %p685_p9 = pnand %p684_p8, %p678_p5 }
  0x30   :  { %688 = shalt.err (!%p685_p9)
}
  0x31   :  { %58 = dma.hbm_to_vmem [thread:$0]  %s869_s5, 1024, %s53_s15, [#allocation5], %s695_s21, %s695_s21, %s696_s22  }
  0x32   :  { %689 = dma.done.wait [#allocation3], 1024  }
  0x33   :  { %690 = vsyncadd [#allocation3], 4294966272 }
  0x34   :  { %691 = dma.done.wait [#allocation5], 2048  }
  0x35   :  { %692 = vsyncadd [#allocation5], 4294965248  ;;  %v698_v0 = vmov 0.0   ;;  %vm699_vm0 = vmmov 0   ;;  %v583_v1 = vld [vmem:[#allocation2] sm:$0xff]   ;;  %v584_v2 = vld [vmem:[#allocation2 + $0x8] sm:$0xff]  }
  0x36   :  { %515 = vmatprep.subr.bf16.mxu0 %v698_v0  ;;  %531 = vmatprep.mubr.msk.bf16.mxu0 %vm699_vm0, %v698_v0  ;;  %v585_v3 = vld [vmem:[#allocation2 + $0x10] sm:$0xff]   ;;  %v586_v4 = vld [vmem:[#allocation2 + $0x18] sm:$0xff]   ;;  %v587_v5 = vld [vmem:[#allocation2 + $0x20] sm:$0xff]  }
  0x37   :  { %535 = vmatprep.subr.bf16.mxu1 %v698_v0  ;;  %551 = vmatprep.mubr.msk.bf16.mxu1 %vm699_vm0, %v698_v0  ;;  %v588_v6 = vld [vmem:[#allocation2 + $0x28] sm:$0xff]   ;;  %v589_v7 = vld [vmem:[#allocation2 + $0x30] sm:$0xff]   ;;  %v590_v8 = vld [vmem:[#allocation2 + $0x38] sm:$0xff]  }
  0x38   :  { %516 = vmatpush3.bf16.msra.mxu0 %v583_v1  ;;  %v71_v9 = vld [vmem:[%s864_s0] sm:$0xff]  ;;  %v592_v12 = vld [vmem:[#allocation4 + $0x8] sm:$0xff]   ;;  %v593_v13 = vld [vmem:[#allocation4 + $0x10] sm:$0xff]  }
  0x39   :  { %517 = vmatprep.subr.bf16.mxu0 %v698_v0  ;;  %v72_v10 = vpack.c.bf16 %v71_v9, %v71_v9  ;;  %v591_v11 = vld [vmem:[#allocation4] sm:$0xff]   ;;  %v594_v15 = vld [vmem:[#allocation4 + $0x18] sm:$0xff]   ;;  %v596_v23 = vld [vmem:[#allocation4 + $0x28] sm:$0xff]  }
  0x3a   :  { %536 = vmatpush3.bf16.msra.mxu1 %v591_v11  ;;  %v457_v14 = vld [vmem:[%s867_s3] ss:$0 sm:$0xff]  ;;  %v597_v24 = vld [vmem:[#allocation4 + $0x30] sm:$0xff]   ;;  %s700_s3 = smov 32   ;;  %v598_v27 = vld [vmem:[#allocation4 + $0x38] sm:$0xff]  }
  0x3b   :  { %537 = vmatprep.subr.bf16.mxu1 %v698_v0  ;;  %v595_v22 = vld [vmem:[#allocation4 + $0x20] sm:$0xff]   ;;  %v600_v37 = vld [vmem:[#allocation6 + $0x8] sm:$0xff]   ;;  %v601_v38 = vld [vmem:[#allocation6 + $0x10] sm:$0xff]  }
  0x3c   :  { %518 = vmatpush3.bf16.msra.mxu0 %v584_v2  ;;  %v599_v36 = vld [vmem:[#allocation6] sm:$0xff]   ;;  %v602_v40 = vld [vmem:[#allocation6 + $0x18] sm:$0xff]   ;;  %v604_v48 = vld [vmem:[#allocation6 + $0x28] sm:$0xff]  }
  0x3d   :  { %519 = vmatprep.subr.bf16.mxu0 %v698_v0  ;;  %v467_v39 = vld [vmem:[%s868_s4] ss:$0 sm:$0xff]  ;;  %v605_v49 = vld [vmem:[#allocation6 + $0x30] sm:$0xff]   ;;  %v606_v52 = vld [vmem:[#allocation6 + $0x38] sm:$0xff]  }
  0x3e   :  { %538 = vmatpush3.bf16.msra.mxu1 %v592_v12  ;;  %v603_v47 = vld [vmem:[#allocation6 + $0x20] sm:$0xff]  }
  0x3f   :  { %539 = vmatprep.subr.bf16.mxu1 %v698_v0  ;;  %v479_v61 = vld [vmem:[%s870_s6] ss:$0 sm:$0xff] }
  0x40   :  { %520 = vmatpush3.bf16.msra.mxu0 %v585_v3 }
  0x41   :  { %521 = vmatprep.subr.bf16.mxu0 %v698_v0 }
  0x42   :  { %540 = vmatpush3.bf16.msra.mxu1 %v593_v13 }
  0x43   :  { %541 = vmatprep.subr.bf16.mxu1 %v698_v0 }
  0x44   :  { %522 = vmatpush3.bf16.msra.mxu0 %v586_v4 }
  0x45   :  { %523 = vmatprep.subr.bf16.mxu0 %v698_v0 }
  0x46   :  { %542 = vmatpush3.bf16.msra.mxu1 %v594_v15 }
  0x47   :  { %543 = vmatprep.subr.bf16.mxu1 %v698_v0 }
  0x48   :  { %524 = vmatpush3.bf16.msra.mxu0 %v587_v5 }
  0x49   :  { %525 = vmatprep.subr.bf16.mxu0 %v698_v0 }
  0x4a   :  { %544 = vmatpush3.bf16.msra.mxu1 %v595_v22 }
  0x4b   :  { %545 = vmatprep.subr.bf16.mxu1 %v698_v0 }
  0x4c   :  { %526 = vmatpush3.bf16.msra.mxu0 %v588_v6 }
  0x4d   :  { %527 = vmatprep.subr.bf16.mxu0 %v698_v0 }
  0x4e   :  { %546 = vmatpush3.bf16.msra.mxu1 %v596_v23 }
  0x4f   :  { %547 = vmatprep.subr.bf16.mxu1 %v698_v0 }
  0x50   :  { %528 = vmatpush3.bf16.msra.mxu0 %v589_v7 }
  0x51   :  { %529 = vmatprep.subr.bf16.mxu0 %v698_v0 }
  0x52   :  { %548 = vmatpush3.bf16.msra.mxu1 %v597_v24 }
  0x53   :  { %549 = vmatprep.subr.bf16.mxu1 %v698_v0 }
  0x54   :  { %530 = vmatpush3.bf16.msra.mxu0 %v590_v8 }
  0x55   :  { %555 = vmatprep.subr.bf16.mxu0 %v698_v0 }
  0x56   :  { %550 = vmatpush3.bf16.msra.mxu1 %v598_v27 }
  0x57   :  { %532 = vmatmul.mubr.bf16.vlgmr.msra.gmra.mrb[0].mxu0 %v72_v10 }
  0x58   :  { %571 = vmatprep.mubr.msk.bf16.mxu0 %vm699_vm0, %v698_v0  ;;  %556 = vmatpush3.bf16.msra.mxu0 %v599_v36 }
  0x59   :  { %557 = vmatprep.subr.bf16.mxu0 %v698_v0 }
  0x5c   :  { %558 = vmatpush3.bf16.msra.mxu0 %v600_v37 }
  0x5d   :  { %559 = vmatprep.subr.bf16.mxu0 %v698_v0 }
  0x60   :  { %560 = vmatpush3.bf16.msra.mxu0 %v601_v38 }
  0x61   :  { %561 = vmatprep.subr.bf16.mxu0 %v698_v0 }
  0x64   :  { %562 = vmatpush3.bf16.msra.mxu0 %v602_v40 }
  0x65   :  { %563 = vmatprep.subr.bf16.mxu0 %v698_v0 }
  0x68   :  { %564 = vmatpush3.bf16.msra.mxu0 %v603_v47 }
  0x69   :  { %565 = vmatprep.subr.bf16.mxu0 %v698_v0 }
  0x6c   :  { %566 = vmatpush3.bf16.msra.mxu0 %v604_v48 }
  0x6d   :  { %567 = vmatprep.subr.bf16.mxu0 %v698_v0 }
  0x70   :  { %568 = vmatpush3.bf16.msra.mxu0 %v605_v49 }
  0x71   :  { %569 = vmatprep.subr.bf16.mxu0 %v698_v0 }
  0x74   :  { %570 = vmatpush3.bf16.msra.mxu0 %v606_v52 }
 0x12a   :  { %v178_v16 = vpop.f32.mrb[0].mxu0 }
 0x12b   :  { %v179_v17 = vadd.f32 %v457_v14, %v178_v16  ;;  %v533_v18 = vpop.f32.mrb[1].mxu0 }
 0x12c   :  { %v181_v19 = vpop.f32.mrb[2].mxu0 }
 0x12d   :  { %v466_v20 = vmul.f32 -1.442695, %v179_v17  ;;  %607 = vtanh.f32 %v179_v17  ;;  %v534_v21 = vpop.f32.mrb[3].mxu0 }
 0x12f   :  { %609 = vpow2.f32 %v466_v20 }
 0x137   :  { %v608_v25 = vpop.eup %607 }
 0x138   :  { %191 = vrot.lane.b32.xlu0 %v608_v25, %s700_s3 }
 0x139   :  { %v610_v26 = vpop.eup %609 }
 0x13a   :  { %v187_v28 = vadd.f32 1.0, %v610_v26 }
 0x13c   :  { %611 = vrcp.f32 %v187_v28 }
 0x146   :  { %v612_v29 = vpop.eup %611 }
 0x147   :  { %193 = vrot.lane.b32.xlu0 %v612_v29, %s695_s21 }
 0x1aa   :  { %v192_v30 = vpop.permute.xlu0 %191 }
 0x1ab   :  { %v195_v31 = vmul.f32 %v612_v29, %v192_v30 }
 0x1ad   :  { %199 = vst [vmem:[%s873_s9] sm:$0xff] %v195_v31  ;;  %613 = vtanh.f32 %v195_v31 }
 0x1b7   :  { %v614_v32 = vpop.eup %613 }
 0x1b9   :  { %v194_v33 = vpop.permute.xlu0 %193 }
 0x1ba   :  { %v197_v34 = vmul.f32 %v614_v32, %v194_v33 }
 0x1bc   :  { %198 = vst [vmem:[%s872_s8] sm:$0xff] %v197_v34  ;;  %v200_v35 = vpack.c.bf16 %v197_v34, %v197_v34 }
 0x1be   :  { %552 = vmatmul.mubr.bf16.vlgmr.msra.gmra.mrb[0].mxu1 %v200_v35 }
 0x291   :  { %v306_v41 = vpop.f32.mrb[0].mxu1 }
 0x292   :  { %v307_v42 = vadd.f32 %v467_v39, %v306_v41  ;;  %v553_v43 = vpop.f32.mrb[1].mxu1 }
 0x293   :  { %v309_v44 = vpop.f32.mrb[2].mxu1 }
 0x294   :  { %v476_v45 = vmul.f32 -1.442695, %v307_v42  ;;  %615 = vtanh.f32 %v307_v42  ;;  %v554_v46 = vpop.f32.mrb[3].mxu1 }
 0x296   :  { %617 = vpow2.f32 %v476_v45 }
 0x29e   :  { %v616_v50 = vpop.eup %615 }
 0x29f   :  { %319 = vrot.lane.b32.xlu1 %v616_v50, %s700_s3 }
 0x2a0   :  { %v618_v51 = vpop.eup %617 }
 0x2a1   :  { %v315_v53 = vadd.f32 1.0, %v618_v51 }
 0x2a3   :  { %619 = vrcp.f32 %v315_v53 }
 0x2ad   :  { %v620_v54 = vpop.eup %619 }
 0x2ae   :  { %321 = vrot.lane.b32.xlu1 %v620_v54, %s695_s21 }
 0x311   :  { %v320_v55 = vpop.permute.xlu1 %319 }
 0x312   :  { %v323_v56 = vmul.f32 %v620_v54, %v320_v55 }
 0x314   :  { %478 = vst [vmem:[%s873_s9 + $0x8] sm:$0xff] %v323_v56  ;;  %621 = vtanh.f32 %v323_v56 }
 0x31e   :  { %v622_v57 = vpop.eup %621 }
 0x320   :  { %v322_v58 = vpop.permute.xlu1 %321 }
 0x321   :  { %v325_v59 = vmul.f32 %v622_v57, %v322_v58 }
 0x323   :  { %477 = vst [vmem:[%s872_s8 + $0x8] sm:$0xff] %v325_v59  ;;  %v330_v60 = vpack.c.bf16 %v325_v59, %v325_v59 }
 0x325   :  { %572 = vmatmul.mubr.bf16.vlgmr.msra.gmra.mrb[4].mxu0 %v330_v60 }
 0x3f8   :  { %v436_v62 = vpop.f32.mrb[4].mxu0 }
 0x3f9   :  { %v437_v63 = vadd.f32 %v479_v61, %v436_v62  ;;  %v573_v0 = vpop.f32.mrb[5].mxu0 }
 0x3fa   :  { %v439_v1 = vpop.f32.mrb[6].mxu0 }
 0x3fb   :  { %442 = vst [vmem:[%s871_s7] sm:$0xff] %v437_v63  ;;  %v574_v2 = vpop.f32.mrb[7].mxu0 }
 0x3fc   :  { %455 = vsyncpa [#allocation3], 1 }
 0x3fd   :  { %456 = vsyncpa [#allocation5], 1 }

</bundles_post_ra>
